<compile_context>
chip_gen: v6e
topology: v6e:2x2x1
jax: 0.10.0
libtpu: 0.0.40
codegen_flags: <defaults>
</compile_context>

<pallas_src>
import jax
import jax.numpy as jnp
from jax.experimental import pallas as pl
from jax.experimental.pallas import tpu as pltpu


def _location_kernel(x_ref, wf_ref, out_ref):
    # x_ref:   (tR, CKp)  im2col rows, contraction dim zero-padded to 8
    # wf_ref:  (CKp, A)   fused conv*dense weight (row index = k*C + c)
    # out_ref: (tR, A)
    out_ref[...] = jnp.dot(x_ref[...], wf_ref[...],
                           preferred_element_type=jnp.float32)


def _choose_row_tile(n_rows, a_dim):
    """Row tile: ~2 MiB f32 output blocks, multiple of 8, and >= 2 grid steps
    whenever n_rows allows (keeps both v7x TensorCores busy)."""
    target = (2 * 1024 * 1024) // (a_dim * 4)
    target = max(256, min(8192, target))
    target = (target // 8) * 8
    if n_rows <= 8:
        return 8
    if n_rows <= 2 * target:
        # split into (roughly) two equal sublane-aligned tiles
        return max(8, ((n_rows + 15) // 16) * 8)
    return target


def location_layer(x, conv_w, dense_w):
    """x: (B, 2, T) f32; conv_w: (F, 2, K); dense_w: (A, F).  Returns (B, T, A)."""
    B, C, T = x.shape
    F_, C2, K = conv_w.shape
    A, F2 = dense_w.shape
    assert C == 2 and C2 == 2 and F2 == F_
    assert K % 2 == 1, "padding=(K-1)//2 reproduces 'same' length only for odd K"
    pad = (K - 1) // 2
    CK = C * K
    CKp = ((CK + 7) // 8) * 8            # sublane-aligned contraction depth

    # --- wrapper glue (cheap XLA ops, ~1x input bytes) -----------------------
    # im2col-lite rows: xcol[b, t, k*C + c] = xpad[b, t + k, c]
    x_tc = jnp.transpose(x, (0, 2, 1))                        # (B, T, C)
    xpad = jnp.pad(x_tc, ((0, 0), (pad, pad), (0, 0)))        # (B, T+2p, C)
    taps = [xpad[:, k:k + T, :] for k in range(K)]            # K x (B, T, C)
    xcol = jnp.concatenate(taps, axis=2)                      # (B, T, C*K)
    xcol = jnp.pad(xcol, ((0, 0), (0, 0), (0, CKp - CK)))     # (B, T, CKp)

    N = B * T
    tR = _choose_row_tile(N, A)
    n_pad = pl.cdiv(N, tR) * tR
    xrows = xcol.reshape(N, CKp)
    if n_pad != N:
        xrows = jnp.pad(xrows, ((0, n_pad - N), (0, 0)))      # (n_pad, CKp)

    # fused weight: wf[k*C + c, a] = sum_f conv_w[f, c, k] * dense_w[a, f]
    wf = jnp.einsum("fck,af->kca", conv_w, dense_w,
                    precision=jax.lax.Precision.HIGHEST).reshape(CK, A)
    wf = jnp.pad(wf, ((0, CKp - CK), (0, 0)))                 # (CKp, A)

    cost = pl.CostEstimate(
        flops=2 * N * CKp * A,
        transcendentals=0,
        bytes_accessed=(n_pad * CKp + CKp * A + n_pad * A) * 4,
    )

    out_rows = pl.pallas_call(
        _location_kernel,
        out_shape=jax.ShapeDtypeStruct((n_pad, A), jnp.float32),
        grid=(n_pad // tR,),
        in_specs=[
            pl.BlockSpec((tR, CKp), lambda i: (i, 0)),        # row tile
            pl.BlockSpec((CKp, A), lambda i: (0, 0)),         # weight, resident
        ],
        out_specs=pl.BlockSpec((tR, A), lambda i: (i, 0)),
        compiler_params=pltpu.CompilerParams(
            dimension_semantics=("parallel",)),
        cost_estimate=cost,
    )(xrows, wf)

    return out_rows[:N].reshape(B, T, A)


def _reference(x, conv_w, dense_w):
    """Pure-JAX reference matching the PyTorch forward."""
    pad = (conv_w.shape[-1] - 1) // 2
    h = jax.lax.conv_general_dilated(
        x, conv_w, window_strides=(1,), padding=[(pad, pad)],
        dimension_numbers=("NCH", "OIH", "NCH"))               # (B, F, T)
    h = jnp.transpose(h, (0, 2, 1))                            # (B, T, F)
    return jnp.einsum("btf,af->bta", h, dense_w)               # (B, T, A)


if __name__ == "__main__":
    # Small, LocationLayer-consistent shapes.
    B, T = 2, 16
    attention_n_filters = 8
    attention_kernel_size = 3
    attention_dim = 16

    key = jax.random.PRNGKey(0)
    k1, k2, k3 = jax.random.split(key, 3)

    # attention_weights_cat: (B, 2, T)  [prev attention weights + cumulative]
    x = jax.random.uniform(k1, (B, 2, T), dtype=jnp.float32)

    # Deterministic (xavier-uniform-ish) parameter init; shapes from __init__.
    fan_conv = 2 * attention_kernel_size + attention_n_filters
    bound_c = (6.0 / fan_conv) ** 0.5
    conv_w = jax.random.uniform(
        k2, (attention_n_filters, 2, attention_kernel_size),
        minval=-bound_c, maxval=bound_c, dtype=jnp.float32)

    gain_tanh = 5.0 / 3.0
    bound_d = gain_tanh * (6.0 / (attention_n_filters + attention_dim)) ** 0.5
    dense_w = jax.random.uniform(
        k3, (attention_dim, attention_n_filters),
        minval=-bound_d, maxval=bound_d, dtype=jnp.float32)

    out = location_layer(x, conv_w, dense_w)
    out = jax.block_until_ready(out)

    ref = _reference(x, conv_w, dense_w)
    assert out.shape == (B, T, attention_dim)
    assert jnp.allclose(out, ref, atol=2e-5, rtol=1e-5), \
        float(jnp.max(jnp.abs(out - ref)))

    print("KERNEL_OK")
</pallas_src>

<mosaic_0001>
module attributes {stable_mosaic.version = 11 : i64} {
  func.func @_location_kernel(%arg0: i32, %arg1: memref<16x8xf32, #tpu.memory_space<vmem>>, %arg2: memref<8x16xf32, #tpu.memory_space<vmem>>, %arg3: memref<16x16xf32, #tpu.memory_space<vmem>>) attributes {dimension_semantics = [#tpu.dimension_semantics<parallel>], iteration_bounds = array<i64: 2>, scalar_prefetch = 0 : i64, scratch_operands = 0 : i64, tpu.core_type = #tpu.core_type<tc>, window_params = [{transform_indices = @transform_0, window_bounds = array<i64: 16, 8>}, {pipeline_mode = #tpu.pipeline_mode<synchronous>, transform_indices = @transform_1, window_bounds = array<i64: 8, 16>}, {transform_indices = @transform_2, window_bounds = array<i64: 16, 16>}]} {
    %c0 = arith.constant 0 : index
    %c0_0 = arith.constant 0 : index
    %0 = vector.load %arg1[%c0, %c0_0] : memref<16x8xf32, #tpu.memory_space<vmem>>, vector<16x8xf32>
    %c0_1 = arith.constant 0 : index
    %c0_2 = arith.constant 0 : index
    %1 = vector.load %arg2[%c0_1, %c0_2] : memref<8x16xf32, #tpu.memory_space<vmem>>, vector<8x16xf32>
    %cst = arith.constant dense<0.000000e+00> : vector<16x16xf32>
    %2 = tpu.matmul %0, %1, %cst {dimension_numbers = #tpu.dot_dimension_numbers<[1], [0], [0], [1], [0, 0, 1, 1], [], []>} : vector<16x8xf32>, vector<8x16xf32>, vector<16x16xf32> -> vector<16x16xf32>
    %c0_3 = arith.constant 0 : index
    %c0_4 = arith.constant 0 : index
    %3 = vector.load %arg3[%c0_3, %c0_4] : memref<16x16xf32, #tpu.memory_space<vmem>>, vector<16x16xf32>
    tpu.vector_store %arg3[%c0_3, %c0_4], %2 {strides = array<i32>} : memref<16x16xf32, #tpu.memory_space<vmem>>, vector<16x16xf32>,
    return
  }
  func.func @transform_0(%arg0: i32) -> (i32, i32) {
    %c0_i32 = arith.constant 0 : i32
    %c0_i32_0 = arith.constant 0 : i32
    return %arg0, %c0_i32 : i32, i32
  }
  func.func @transform_1(%arg0: i32) -> (i32, i32) {
    %c0_i32 = arith.constant 0 : i32
    %c0_i32_0 = arith.constant 0 : i32
    %c0_i32_1 = arith.constant 0 : i32
    return %c0_i32, %c0_i32_0 : i32, i32
  }
  func.func @transform_2(%arg0: i32) -> (i32, i32) {
    %c0_i32 = arith.constant 0 : i32
    %c0_i32_0 = arith.constant 0 : i32
    return %arg0, %c0_i32 : i32, i32
  }
}

</mosaic_0001>

<bundles_post_ra>
// kernel: tpu_custom_call.1
= control target key start
LH: loop header
LB: loop body
LE: loop exit
PB: predicated region body
PF: predicated region fallthrough
CT: control target
= control target key end

     0   :  { %s343_s9 = smov 0   ;;  %s357_s0 = inlined_call_operand.vmem [shape: f32[32,8], index: 0, kind: input, shape index: {}]   ;;  %s358_s1 = inlined_call_operand.vmem [shape: f32[8,16], index: 1, kind: input, shape index: {}]   ;;  %s359_s2 = inlined_call_operand.vmem [shape: f32[32,16], index: 2, kind: output, shape index: {}]  }
   0x1 LB: > { %s291_s10 = sadd.s32 4294967295, %s326_s9   ;;  %p295_p0 = scmp.ge.s32.totalorder %s326_s9, 1  ;;  %s326_s9 = sphi %s343_s9, %s12_s9  }
   0x2   : > { %p113_p1 = scmp.lt.s32.totalorder %s326_s9, 3 }
   0x4   : > { %p114_p2 = pnand %p295_p0, %p113_p1 }
   0x5   : > { %s296_s13 = sshll.u32 (!%p114_p2), %s291_s10, 1 }
   0x6   : > { %117 = sbr.rel (%p114_p2) target bundleno = 212 (0xd4), region = 28  ;;  %p136_p3 = scmp.lt.s32.totalorder (!%p114_p2), %s296_s13, 3 }
   0xb   : > { %v149_v0 = vld [vmem:[%s358_s1] sm:$0xff]  ;;  %s361_s13 = smov (!%p136_p3, %s296_s13), 3  ;;  %vm150_vm0 = vcmask 64512   ;;  %vm232_vm1 = vcmask 130048  }
   0xc   : > { %307 = vmatprep.subr.mxu0 %v149_v0  ;;  %s297_s14 = sshll.u32 %s361_s13, 3 }
   0xd   : > { %308 = vmatpush3.msra.mxu0 %v149_v0  ;;  %s139_s17 = scalar_lea.vmem %s357_s0, %s297_s14  ;;  %s145_s20 = scalar_lea.vmem %s359_s2, %s297_s14 }
   0xe   : > { %v147_v1 = vld [vmem:[%s139_s17] sm:$0xff]  ;;  %v148_v2 = vld [vmem:[%s139_s17 + $0x8] sm:$0xff] }
   0xf   : > { %309 = vmatprep.mubr.msk.f32.mxu0 %vm150_vm0, %v147_v1 }
  0x10   : > { %310 = vmatmul.mubr.msk.f32.vlgmr.msra.gmra.mxu0 %vm150_vm0, %v148_v2 }
  0xd0   : > { %v311_v3 = vpop.f32.mrf.mxu0 }
  0xd1   : > { %234 = vst.msk [vmem:[%s145_s20 + $0x8] sm:$0xff] %vm232_vm1, %v311_v3 }
  0xd2   : > { %v223_v4 = vpop.f32.mrf.mxu0 }
  0xd3   : > { %233 = vst.msk [vmem:[%s145_s20] sm:$0xff] %vm232_vm1, %v223_v4 }
  0xd4 PF: > { %s12_s9 = sadd.s32 1, %s326_s9  }
  0xd5   : > { %p9_p4 = scmp.ge.s32.totalorder %s12_s9, 4  }
  0xd7   :  { %11 = sbr.rel (!%p9_p4) target bundleno = 1 (0x1), region = 58 }

</bundles_post_ra>
